<compile_context>
chip_gen: v5e
topology: v5e:2x2
jax: 0.10.0
libtpu: 0.0.40
codegen_flags: <defaults>
</compile_context>

<pallas_src>
import jax
import jax.numpy as jnp
from jax.experimental import pallas as pl
from jax.experimental.pallas import tpu as pltpu

EPS_IN = 1e-3   # InstanceNorm2d eps
EPS_BN = 1e-5   # BatchNorm2d eps


# ---------------------------------------------------------------------------
# Pass 1: per-sample InstanceNorm statistics of x.
# Refs: x (C, S) -> m1 (C, 1), v1 (C, 1)   (biased variance, centered formula)
# ---------------------------------------------------------------------------
def _stats1_kernel(x_ref, m_ref, v_ref):
    x = x_ref[...]                                   # (C, S), f32, S on lanes
    m = jnp.mean(x, axis=1, keepdims=True)           # (C, 1)
    d = x - m
    v = jnp.mean(d * d, axis=1, keepdims=True)       # (C, 1)
    m_ref[...] = m
    v_ref[...] = v


# ---------------------------------------------------------------------------
# Pass 2: fused stage-1 (IN+BN+affine+ReLU folded into scale/shift) + conv1,
# then per-sample InstanceNorm statistics of the conv1 output.
# ---------------------------------------------------------------------------
def _stats2_kernel(x_ref, m1_ref, s1_ref, t1_ref, w1_ref, m2_ref, v2_ref):
    x = x_ref[...]                                                      # (C, S)
    h = jnp.maximum((x - m1_ref[...]) * s1_ref[...] + t1_ref[...], 0.0)  # fused norm+ReLU
    # conv1 as a plain (O,C)@(C,S) matmul; bias omitted (cancelled by the next IN).
    z = jnp.dot(w1_ref[...], h, preferred_element_type=jnp.float32)     # (C, S)
    m2 = jnp.mean(z, axis=1, keepdims=True)
    d = z - m2
    v2 = jnp.mean(d * d, axis=1, keepdims=True)
    m2_ref[...] = m2
    v2_ref[...] = v2


# ---------------------------------------------------------------------------
# Pass 3: full fused forward for one sample + identity residual.
# ---------------------------------------------------------------------------
def _main_kernel(x_ref, m1_ref, s1_ref, t1_ref, w1_ref,
                 m2_ref, s2_ref, t2_ref, w2_ref, b2_ref, o_ref):
    x = x_ref[...]                                                      # (C, S)
    h = jnp.maximum((x - m1_ref[...]) * s1_ref[...] + t1_ref[...], 0.0)
    z = jnp.dot(w1_ref[...], h, preferred_element_type=jnp.float32)     # conv1 (no bias)
    g = jnp.maximum((z - m2_ref[...]) * s2_ref[...] + t2_ref[...], 0.0)
    y = jnp.dot(w2_ref[...], g, preferred_element_type=jnp.float32)     # conv2
    o_ref[...] = y + b2_ref[...] + x                                    # lane-dense store


# ---------------------------------------------------------------------------
# Wrapper
# ---------------------------------------------------------------------------
def pointcn_forward(params, x_nchw):
    """PointCN forward. x_nchw: (B, C, H, W) -> (B, C, H, W).

    Weight shapes (straight from the PyTorch module, no transposes):
      w1, w2:  (C, C)  = Conv2d.weight[:, :, 0, 0]
      b1, b2:  (C,)    = Conv2d.bias   (b1 is mathematically cancelled by the 2nd IN)
      bn*_w/b: (C,)    = BatchNorm2d.weight / .bias
    """
    B, C, H, W = x_nchw.shape
    S = H * W
    f32 = jnp.float32
    x = x_nchw.reshape(B, C, S).astype(f32)          # reshape only, no transpose

    w1 = jnp.asarray(params["w1"], f32)
    w2 = jnp.asarray(params["w2"], f32)
    b2 = jnp.asarray(params["b2"], f32).reshape(C, 1)
    bn1w = jnp.asarray(params["bn1_w"], f32).reshape(1, C, 1)
    bn1b = jnp.asarray(params["bn1_b"], f32).reshape(C, 1)
    bn2w = jnp.asarray(params["bn2_w"], f32).reshape(1, C, 1)
    bn2b = jnp.asarray(params["bn2_b"], f32).reshape(C, 1)

    grid = (B,)
    cp = pltpu.CompilerParams(dimension_semantics=("parallel",))

    # Per-sample blocks: batch dim squeezed out, spatial S stays whole (on lanes).
    x_spec = pl.BlockSpec((None, C, S), lambda b: (b, 0, 0))
    vec_spec = pl.BlockSpec((None, C, 1), lambda b: (b, 0, 0))   # per-(b,c) scalars
    mat_spec = pl.BlockSpec((C, C), lambda b: (0, 0))            # shared weights
    col_spec = pl.BlockSpec((C, 1), lambda b: (0, 0))            # shared per-channel cols

    stat_shape = jax.ShapeDtypeStruct((B, C, 1), f32)

    # ---- pass 1: IN stats of x -------------------------------------------------
    m1, v1 = pl.pallas_call(
        _stats1_kernel,
        grid=grid,
        in_specs=[x_spec],
        out_specs=(vec_spec, vec_spec),
        out_shape=(stat_shape, stat_shape),
        compiler_params=cp,
    )(x)

    # Analytic BN1 stats + folding (tiny (B,C) math, done in plain JAX):
    #   after IN the spatial mean is 0 and the spatial var is v/(v+eps_in).
    vb1 = jnp.mean(v1 / (v1 + EPS_IN), axis=0, keepdims=True)            # (1, C, 1)
    scale1 = bn1w * jax.lax.rsqrt(v1 + EPS_IN) * jax.lax.rsqrt(vb1 + EPS_BN)  # (B, C, 1)
    shift1 = bn1b                                                        # (C, 1)

    # ---- pass 2: stage-1 transform + conv1, IN stats of conv1 output ------------
    m2, v2 = pl.pallas_call(
        _stats2_kernel,
        grid=grid,
        in_specs=[x_spec, vec_spec, vec_spec, col_spec, mat_spec],
        out_specs=(vec_spec, vec_spec),
        out_shape=(stat_shape, stat_shape),
        compiler_params=cp,
    )(x, m1, scale1, shift1, w1)

    vb2 = jnp.mean(v2 / (v2 + EPS_IN), axis=0, keepdims=True)
    scale2 = bn2w * jax.lax.rsqrt(v2 + EPS_IN) * jax.lax.rsqrt(vb2 + EPS_BN)
    shift2 = bn2b

    # ---- pass 3: full fused forward + residual ----------------------------------
    out = pl.pallas_call(
        _main_kernel,
        grid=grid,
        in_specs=[x_spec, vec_spec, vec_spec, col_spec, mat_spec,
                  vec_spec, vec_spec, col_spec, mat_spec, col_spec],
        out_specs=x_spec,
        out_shape=jax.ShapeDtypeStruct((B, C, S), f32),
        compiler_params=cp,
    )(x, m1, scale1, shift1, w1, m2, scale2, shift2, w2, b2)

    return out.reshape(B, C, H, W)


# ---------------------------------------------------------------------------
# Plain-JAX reference mirroring the PyTorch module (training-mode BatchNorm).
# ---------------------------------------------------------------------------
def reference(params, x):
    def inorm(y, eps):
        m = y.mean(axis=(2, 3), keepdims=True)
        v = ((y - m) ** 2).mean(axis=(2, 3), keepdims=True)
        return (y - m) / jnp.sqrt(v + eps)

    def bnorm(y, w, b, eps):
        m = y.mean(axis=(0, 2, 3), keepdims=True)
        v = ((y - m) ** 2).mean(axis=(0, 2, 3), keepdims=True)
        y = (y - m) / jnp.sqrt(v + eps)
        return y * w.reshape(1, -1, 1, 1) + b.reshape(1, -1, 1, 1)

    def conv1x1(y, w, b):
        return jnp.einsum("oc,bchw->bohw", w, y) + b.reshape(1, -1, 1, 1)

    y = inorm(x, EPS_IN)
    y = bnorm(y, params["bn1_w"], params["bn1_b"], EPS_BN)
    y = jnp.maximum(y, 0.0)
    y = conv1x1(y, params["w1"], params["b1"])
    y = inorm(y, EPS_IN)
    y = bnorm(y, params["bn2_w"], params["bn2_b"], EPS_BN)
    y = jnp.maximum(y, 0.0)
    y = conv1x1(y, params["w2"], params["b2"])
    return y + x


if __name__ == "__main__":
    # PointCN consumes point-feature maps shaped (B, C, N, 1); N a multiple of 128 so the
    # in-kernel spatial (lane) dim is fully dense.
    B, C, N = 2, 32, 256
    H, W = N, 1

    key = jax.random.PRNGKey(0)
    ks = jax.random.split(key, 9)
    params = {
        "bn1_w": 1.0 + 0.1 * jax.random.normal(ks[0], (C,), jnp.float32),
        "bn1_b": 0.1 * jax.random.normal(ks[1], (C,), jnp.float32),
        "w1":    0.2 * jax.random.normal(ks[2], (C, C), jnp.float32),
        "b1":    0.1 * jax.random.normal(ks[3], (C,), jnp.float32),  # cancelled by 2nd IN
        "bn2_w": 1.0 + 0.1 * jax.random.normal(ks[4], (C,), jnp.float32),
        "bn2_b": 0.1 * jax.random.normal(ks[5], (C,), jnp.float32),
        "w2":    0.2 * jax.random.normal(ks[6], (C, C), jnp.float32),
        "b2":    0.1 * jax.random.normal(ks[7], (C,), jnp.float32),
    }
    x = jax.random.normal(ks[8], (B, C, H, W), jnp.float32)

    out = jax.block_until_ready(pointcn_forward(params, x))
    ref = reference(params, x)

    assert out.shape == (B, C, H, W), out.shape
    max_err = float(jnp.abs(out - ref).max())
    assert jnp.allclose(out, ref, atol=5e-4, rtol=5e-4), max_err
    print("KERNEL_OK")
</pallas_src>

<mosaic_0001>
module attributes {stable_mosaic.version = 11 : i64} {
  func.func @_stats1_kernel(%arg0: i32, %arg1: memref<1x32x256xf32, #tpu.memory_space<vmem>>, %arg2: memref<1x32x1xf32, #tpu.memory_space<vmem>>, %arg3: memref<1x32x1xf32, #tpu.memory_space<vmem>>) attributes {dimension_semantics = [#tpu.dimension_semantics<parallel>], iteration_bounds = array<i64: 2>, scalar_prefetch = 0 : i64, scratch_operands = 0 : i64, tpu.core_type = #tpu.core_type<tc>, window_params = [{transform_indices = @transform_0, window_bounds = array<i64: 1, 32, 256>}, {transform_indices = @transform_1, window_bounds = array<i64: 1, 32, 1>}, {transform_indices = @transform_2, window_bounds = array<i64: 1, 32, 1>}]} {
    %c0 = arith.constant 0 : index
    %c0_0 = arith.constant 0 : index
    %c0_1 = arith.constant 0 : index
    %0 = vector.load %arg1[%c0, %c0_0, %c0_1] : memref<1x32x256xf32, #tpu.memory_space<vmem>>, vector<1x32x256xf32>
    %1 = vector.shape_cast %0 : vector<1x32x256xf32> to vector<32x256xf32>
    %cst = arith.constant dense<0.000000e+00> : vector<32xf32>
    %2 = vector.multi_reduction <add>, %1, %cst [1] : vector<32x256xf32> to vector<32xf32>
    %3 = vector.shape_cast %2 : vector<32xf32> to vector<32x1xf32>
    %cst_2 = arith.constant 2.560000e+02 : f32
    %4 = vector.broadcast %cst_2 : f32 to vector<32x1xf32>
    %5 = arith.divf %3, %4 : vector<32x1xf32>
    %6 = vector.broadcast %5 : vector<32x1xf32> to vector<32x256xf32>
    %7 = arith.subf %1, %6 : vector<32x256xf32>
    %8 = arith.mulf %7, %7 : vector<32x256xf32>
    %cst_3 = arith.constant dense<0.000000e+00> : vector<32xf32>
    %9 = vector.multi_reduction <add>, %8, %cst_3 [1] : vector<32x256xf32> to vector<32xf32>
    %10 = vector.shape_cast %9 : vector<32xf32> to vector<32x1xf32>
    %cst_4 = arith.constant 2.560000e+02 : f32
    %11 = vector.broadcast %cst_4 : f32 to vector<32x1xf32>
    %12 = arith.divf %10, %11 : vector<32x1xf32>
    %c0_5 = arith.constant 0 : index
    %c0_6 = arith.constant 0 : index
    %c0_7 = arith.constant 0 : index
    %13 = vector.load %arg2[%c0_5, %c0_6, %c0_7] : memref<1x32x1xf32, #tpu.memory_space<vmem>>, vector<1x32x1xf32>
    %14 = vector.shape_cast %13 : vector<1x32x1xf32> to vector<32x1xf32>
    %15 = vector.shape_cast %5 : vector<32x1xf32> to vector<1x32x1xf32>
    tpu.vector_store %arg2[%c0_5, %c0_6, %c0_7], %15 {strides = array<i32>} : memref<1x32x1xf32, #tpu.memory_space<vmem>>, vector<1x32x1xf32>,
    %c0_8 = arith.constant 0 : index
    %c0_9 = arith.constant 0 : index
    %c0_10 = arith.constant 0 : index
    %16 = vector.load %arg3[%c0_8, %c0_9, %c0_10] : memref<1x32x1xf32, #tpu.memory_space<vmem>>, vector<1x32x1xf32>
    %17 = vector.shape_cast %16 : vector<1x32x1xf32> to vector<32x1xf32>
    %18 = vector.shape_cast %12 : vector<32x1xf32> to vector<1x32x1xf32>
    tpu.vector_store %arg3[%c0_8, %c0_9, %c0_10], %18 {strides = array<i32>} : memref<1x32x1xf32, #tpu.memory_space<vmem>>, vector<1x32x1xf32>,
    return
  }
  func.func @transform_0(%arg0: i32) -> (i32, i32, i32) {
    %c0_i32 = arith.constant 0 : i32
    %c0_i32_0 = arith.constant 0 : i32
    %c0_i32_1 = arith.constant 0 : i32
    return %arg0, %c0_i32, %c0_i32_0 : i32, i32, i32
  }
  func.func @transform_1(%arg0: i32) -> (i32, i32, i32) {
    %c0_i32 = arith.constant 0 : i32
    %c0_i32_0 = arith.constant 0 : i32
    %c0_i32_1 = arith.constant 0 : i32
    return %arg0, %c0_i32, %c0_i32_0 : i32, i32, i32
  }
  func.func @transform_2(%arg0: i32) -> (i32, i32, i32) {
    %c0_i32 = arith.constant 0 : i32
    %c0_i32_0 = arith.constant 0 : i32
    %c0_i32_1 = arith.constant 0 : i32
    return %arg0, %c0_i32, %c0_i32_0 : i32, i32, i32
  }
}

</mosaic_0001>

<bundles_post_ra>
// kernel: tpu_custom_call.1
= control target key start
LH: loop header
LB: loop body
LE: loop exit
PB: predicated region body
PF: predicated region fallthrough
CT: control target
= control target key end

     0   :  { %8 = vsyncpa [#allocation3], 0  ;;  %s606_s0 = inlined_call_operand.hbm [shape: f32[2,32,256], index: 0, kind: input, shape index: {}]   ;;  %s607_s1 = inlined_call_operand.vmem [shape: f32[2,32,1], index: 1, kind: output, shape index: {0}]   ;;  %s608_s2 = inlined_call_operand.vmem [shape: f32[2,32,1], index: 2, kind: output, shape index: {1}]  }
   0x1   :  { %10 = vsyncpa [#allocation3 + $0x1], 0  ;;  %s496_s9 = smov 0   ;;  %s498_s10 = smov 0  }
   0x2   :  { %s500_s11 = smov 0   ;;  %s502_s12 = smov 0  }
   0x3 LB: > { %s515_s13 = sadd.s32 4294967295, %s476_s12   ;;  %s518_s14 = sadd.s32 1, %s476_s12   ;;  %s476_s12 = sphi %s502_s12, %s615_s12   ;;  %s472_s11 = sphi %s500_s11, %s614_s11   ;;  %s468_s10 = sphi %s498_s10, %s613_s10   ;;  %s464_s9 = sphi %s496_s9, %s612_s9  }
   0x4   : > { %s20_s15 = ssub.s32 %s476_s12, %s518_s14  ;;  %s23_s16 = sadd.s32 1, %s472_s11 }
   0x5   : > { %p21_p0 = scmp.eq.s32.totalorder %s20_s15, 0  ;;  %p30_p1 = scmp.ne.s32.totalorder %s472_s11, %s468_s10 }
   0x6   : > { %p31_p2 = scmp.eq.s32.totalorder %s476_s12, 0  ;;  %p36_p3 = scmp.ne.s32.totalorder %s468_s10, %s464_s9 }
   0x7   : > { %s528_s17 = scalar_select %p21_p0, %s472_s11, %s23_s16  }
   0x8   : > { %p530_p4 = por %p31_p2, %p30_p1  ;;  %p37_p5 = scmp.eq.s32.totalorder %s515_s13, 0 }
   0x9   : > { %p374_p6 = scmp.lt.s32.totalorder %s476_s12, 2  ;;  %s112_s20 = sand.u32 1, %s472_s11  }
   0xa   : > { %p536_p7 = por %p37_p5, %p36_p3  ;;  %s354_s21 = sshll.u32 %s112_s20, 6 }
   0xb   : > { %s365_s22 = sshll.u32 %s476_s12, 6  ;;  %s116_s26 = scalar_lea.vmem [#allocation2], %s354_s21 }
   0xc   : > { %s121_s25 = scalar_lea.hbm %s606_s0, %s365_s22  ;;  %s124_s27 = sshll.u32 %s116_s26, 4  ;;  %s125_s27 = int_to_ptr.vmem [resolvable:$true] %s124_s27 }
   0xd   : > { %s122_s28 = sshll.u32 %s121_s25, 4  ;;  %p547_p8 = pnand %p374_p6, %p530_p4  ;;  %s123_s28 = int_to_ptr.hbm [resolvable:$true] %s122_s28 }
   0xe   : > { %p357_p9 = scmp.ge.s32.totalorder %s476_s12, 1  ;;  %s113_s30 = scalar_lea.sflag [#allocation3], %s112_s20 }
   0xf   : > { %s412_s3 = sshra.s32 %s123_s28, 4  ;;  %p416_p11 = pneg %p547_p8  ;;  %s413_s3 = int_to_ptr.hbm [resolvable:$true] %s412_s3 }
  0x10   : > { %s414_s4 = scalar_lea.hbm %s413_s3, 64  ;;  %s419_s7 = scalar_lea.hbm %s606_s0, 128 }
  0x11   : > { %p415_p10 = scmp.ne.s32.totalorder %s413_s3, %s414_s4  ;;  %p420_p0 = scmp.lt.s32.totalorder %s413_s3, %s606_s0 }
  0x12   : > { %p421_p1 = scmp.lt.s32.totalorder %s419_s7, %s414_s4 }
  0x13   : > { %p417_p12 = pnand %p416_p11, %p415_p10 }
  0x14   : > { %p422_p2 = por %p421_p1, %p420_p0 }
  0x15   : > { %p418_p13 = pneg %p417_p12 }
  0x17   : > { %p423_p3 = pnand %p422_p2, %p418_p13 }
  0x19   : > { %426 = shalt.err (!%p423_p3)
}
  0x1a   : > { %s478_s15 = smov 256   ;;  %s479_s16 = smov 16  }
  0x1b   : > { %373 = dma.hbm_to_vmem [thread:$0]  (!%p547_p8), %s123_s28, 1024, %s125_s27, %s113_s30, %s478_s15, %s478_s15, %s479_s16  }
  0x1c   : > { %p132_p4 = scmp.lt.s32.totalorder %s476_s12, 3 }
  0x1e   : > { %p133_p5 = pnand %p357_p9, %p132_p4 }
  0x1f   : > { %s138_s18 = sand.u32 (!%p133_p5), 1, %s468_s10  }
  0x20   : > { %136 = sbr.rel (%p133_p5) target bundleno = 293 (0x125), region = 24  ;;  %s358_s20 = sshll.u32 (!%p133_p5), %s138_s18, 6 }
  0x21   : > { %s139_s21 = scalar_lea.sflag (!%p133_p5), [#allocation3], %s138_s18  ;;  %s142_s22 = scalar_lea.vmem (!%p133_p5), [#allocation2], %s358_s20 }
  0x25   : > { %459 = dma.done.wait (%p536_p7), %s139_s21, 1024  }
  0x26   : > { %461 = vsyncadd (%p536_p7), %s139_s21, 4294966272  ;;  %v183_v0 = vld [vmem:[%s142_s22 + $0x20] sm:$0xff]  ;;  %v184_v1 = vld [vmem:[%s142_s22 + $0x28] sm:$0xff]  ;;  %v480_v12 = vmov 256.0   ;;  %p169_p6 = scmp.lt.s32.totalorder %s515_s13, 1  ;;  %vm242_vm1 = vcmask 7168  }
  0x27   : > { %v179_v2 = vld [vmem:[%s142_s22] sm:$0xff]  ;;  %v193_v3 = vadd.f32 %v184_v1, %v183_v0  ;;  %v180_v4 = vld [vmem:[%s142_s22 + $0x8] sm:$0xff]  ;;  %v185_v6 = vld [vmem:[%s142_s22 + $0x30] sm:$0xff]  ;;  %410 = vrcp.f32 %v480_v12 }
  0x28   : > { %v187_v5 = vadd.f32 %v180_v4, %v179_v2  ;;  %v186_v7 = vld [vmem:[%s142_s22 + $0x38] sm:$0xff]  ;;  %v181_v8 = vld [vmem:[%s142_s22 + $0x10] sm:$0xff]  ;;  %s617_s13 = smov (!%p169_p6, %s515_s13), 1 }
  0x29   : > { %194 = vadd.xlane.f32.xlu1 %v193_v3  ;;  %v182_v9 = vld [vmem:[%s142_s22 + $0x18] sm:$0xff]  ;;  %v196_v10 = vadd.f32 %v186_v7, %v185_v6  ;;  %s366_s12 = sshll.u32 %s617_s13, 5 }
  0x2a   : > { %188 = vadd.xlane.f32.xlu0 %v187_v5  ;;  %v190_v11 = vadd.f32 %v182_v9, %v181_v8  ;;  %s173_s24 = scalar_lea.vmem %s607_s1, %s366_s12  ;;  %s178_s27 = scalar_lea.vmem %s608_s2, %s366_s12 }
  0x2d   : > { %v411_v13 = vpop.eup %410 }
  0x2e   : > { %v200_v14 = vmul.f32 256.0, %v411_v13  ;;  %vm204_vm0 = vweird.f32 %v411_v13 }
  0x30   : > { %v201_v15 = vsub.f32 1.0, %v200_v14 }
  0x31   : > { %197 = vadd.xlane.f32.xlu1 %v196_v10 }
  0x32   : > { %191 = vadd.xlane.f32.xlu0 %v190_v11  ;;  %v202_v16 = vmul.f32 %v411_v13, %v201_v15 }
  0x34   : > { %v203_v17 = vadd.f32 %v411_v13, %v202_v16 }
  0x36   : > { %v205_v18 = vsel %vm204_vm0, %v411_v13, %v203_v17 }
  0x9c   : > { %v195_v19 = vpop.xlane.xlu1 %194 }
  0x9d   : > { %v208_v20 = vmul.f32 %v205_v18, %v195_v19  ;;  %v189_v21 = vpop.xlane.xlu0 %188 }
  0x9e   : > { %v206_v22 = vmul.f32 %v205_v18, %v189_v21 }
  0x9f   : > { %245 = vst.msk [vmem:[%s173_s24 + $0x10] sm:$0xff] %vm242_vm1, %v208_v20  ;;  %v214_v23 = vsub.f32 %v183_v0, %v208_v20  ;;  %v215_v24 = vsub.f32 %v184_v1, %v208_v20 }
  0xa0   : > { %243 = vst.msk [vmem:[%s173_s24] sm:$0xff] %vm242_vm1, %v206_v22  ;;  %v210_v25 = vsub.f32 %v179_v2, %v206_v22  ;;  %v211_v26 = vsub.f32 %v180_v4, %v206_v22 }
  0xa1   : > { %v222_v27 = vmul.f32 %v214_v23, %v214_v23  ;;  %v223_v28 = vmul.f32 %v215_v24, %v215_v24 }
  0xa2   : > { %v218_v29 = vmul.f32 %v210_v25, %v210_v25  ;;  %v219_v30 = vmul.f32 %v211_v26, %v211_v26 }
  0xa3   : > { %v232_v31 = vadd.f32 %v223_v28, %v222_v27 }
  0xa4   : > { %v198_v32 = vpop.xlane.xlu1 %197  ;;  %v226_v33 = vadd.f32 %v219_v30, %v218_v29 }
  0xa5   : > { %v209_v34 = vmul.f32 %v205_v18, %v198_v32  ;;  %v192_v35 = vpop.xlane.xlu0 %191  ;;  %233 = vadd.xlane.f32.xlu0 %v232_v31 }
  0xa6   : > { %v207_v36 = vmul.f32 %v205_v18, %v192_v35  ;;  %227 = vadd.xlane.f32.xlu2 %v226_v33 }
  0xa7   : > { %246 = vst.msk [vmem:[%s173_s24 + $0x18] sm:$0xff] %vm242_vm1, %v209_v34  ;;  %v216_v37 = vsub.f32 %v185_v6, %v209_v34  ;;  %v217_v38 = vsub.f32 %v186_v7, %v209_v34 }
  0xa8   : > { %244 = vst.msk [vmem:[%s173_s24 + $0x8] sm:$0xff] %vm242_vm1, %v207_v36  ;;  %v212_v39 = vsub.f32 %v181_v8, %v207_v36  ;;  %v213_v40 = vsub.f32 %v182_v9, %v207_v36 }
  0xa9   : > { %v224_v41 = vmul.f32 %v216_v37, %v216_v37  ;;  %v225_v42 = vmul.f32 %v217_v38, %v217_v38 }
  0xaa   : > { %v220_v43 = vmul.f32 %v212_v39, %v212_v39  ;;  %v221_v44 = vmul.f32 %v213_v40, %v213_v40 }
  0xab   : > { %v235_v45 = vadd.f32 %v225_v42, %v224_v41 }
  0xac   : > { %v229_v46 = vadd.f32 %v221_v44, %v220_v43 }
  0xad   : > { %236 = vadd.xlane.f32.xlu1 %v235_v45 }
  0xae   : > { %230 = vadd.xlane.f32.xlu2 %v229_v46 }
 0x118   : > { %v234_v47 = vpop.xlane.xlu0 %233 }
 0x119   : > { %v228_v48 = vpop.xlane.xlu2 %227  ;;  %v240_v49 = vmul.f32 %v234_v47, %v205_v18 }
 0x11a   : > { %v238_v50 = vmul.f32 %v228_v48, %v205_v18 }
 0x11b   : > { %249 = vst.msk [vmem:[%s178_s27 + $0x10] sm:$0xff] %vm242_vm1, %v240_v49 }
 0x11c   : > { %247 = vst.msk [vmem:[%s178_s27] sm:$0xff] %vm242_vm1, %v238_v50 }
 0x120   : > { %v237_v51 = vpop.xlane.xlu1 %236 }
 0x121   : > { %v241_v52 = vmul.f32 %v237_v51, %v205_v18  ;;  %v231_v53 = vpop.xlane.xlu2 %230 }
 0x122   : > { %v239_v54 = vmul.f32 %v231_v53, %v205_v18 }
 0x123   : > { %250 = vst.msk [vmem:[%s178_s27 + $0x18] sm:$0xff] %vm242_vm1, %v241_v52 }
 0x124   : > { %248 = vst.msk [vmem:[%s178_s27 + $0x8] sm:$0xff] %vm242_vm1, %v239_v54 }
 0x125 PF: > { %p13_p7 = scmp.ge.s32.totalorder %s518_s14, 4   ;;  %s612_s9 = smov %s468_s10 }
 0x126   : > { %s613_s10 = smov %s472_s11  ;;  %s614_s11 = smov %s528_s17 }
 0x127   : > { %s615_s12 = smov %s518_s14  ;;  %15 = sbr.rel (!%p13_p7) target bundleno = 3 (0x3), region = 76 }
 0x12c   :  { %288 = vsyncpa [#allocation3], 1 }
 0x12d   :  { %290 = vsyncpa [#allocation3 + $0x1], 1 }

</bundles_post_ra>
